<compile_context>
chip_gen: v7x
topology: tpu7x:2x2x1
jax: 0.10.0
libtpu: 0.0.40
codegen_flags: <defaults>
</compile_context>

<pallas_src>
import jax
import jax.numpy as jnp
from jax.experimental import pallas as pl
from jax.experimental.pallas import tpu as pltpu


def _round_up(x, m):
    return ((x + m - 1) // m) * m


def mlp_kernel(x_ref, w1_ref, b1_ref, w2_ref, b2_ref, o_ref):
    # fc1 + ReLU: MXU matmul (f32 accumulate), VPU bias-add + max.
    h = jnp.dot(x_ref[...], w1_ref[...], preferred_element_type=jnp.float32)
    h = jnp.maximum(h + b1_ref[...], 0.0)
    # fc2: contraction over the (padded) hidden dim, output already at native width.
    y = jnp.dot(h.astype(w2_ref.dtype), w2_ref[...],
                preferred_element_type=jnp.float32)
    o_ref[...] = (y + b2_ref[...]).astype(o_ref.dtype)


def prepare_params(w1, b1, w2, b2):
    """One-time prep: zero-pad only the hidden (contraction) dim to 128 lanes.

    w1: (F, hidden), b1: (1, hidden), w2: (hidden, n_classes), b2: (1, n_classes).
    Padded hidden columns produce 0 through ReLU and contribute 0 in fc2, so the
    math is exact.  Call this once; reuse the result across forward calls.
    """
    F, hidden = w1.shape
    n_classes = w2.shape[1]
    HP = _round_up(hidden, 128)
    w1p = jnp.zeros((F, HP), jnp.float32).at[:, :hidden].set(w1)
    b1p = jnp.zeros((1, HP), jnp.float32).at[:, :hidden].set(b1)
    w2p = jnp.zeros((HP, n_classes), jnp.float32).at[:hidden, :].set(w2)
    b2p = b2.reshape(1, n_classes).astype(jnp.float32)
    return w1p, b1p, w2p, b2p


def net_forward(x, w1p, b1p, w2p, b2p, *, tb=2048, out_dtype=jnp.float32):
    """y = relu(x @ w1 + b1) @ w2 + b2, with pre-padded params from prepare_params."""
    B, F = x.shape
    HP = w1p.shape[1]
    n_classes = w2p.shape[1]

    # Batch tile: multiple of 8 sublanes, capped at tb.
    TB = min(tb, _round_up(B, 8))
    steps = pl.cdiv(B, TB)
    # v7x has 2 TensorCores; keep the grid length even when >1 so both stay busy.
    if steps > 1 and steps % 2 == 1:
        steps += 1
        TB = max(8, _round_up(-(-B // steps), 8))
        steps = pl.cdiv(B, TB)
    grid = (steps,)

    hidden_true = 10  # logical hidden width (for the FLOP estimate only)
    cost = pl.CostEstimate(
        flops=2 * B * (F * hidden_true + hidden_true * n_classes),
        transcendentals=0,
        bytes_accessed=4 * (B * F + F * HP + HP + HP * n_classes
                            + n_classes + B * n_classes),
    )

    return pl.pallas_call(
        mlp_kernel,
        out_shape=jax.ShapeDtypeStruct((B, n_classes), out_dtype),
        grid=grid,
        in_specs=[
            pl.BlockSpec((TB, F), lambda i: (i, 0)),          # x: tiled over batch
            pl.BlockSpec((F, HP), lambda i: (0, 0)),          # w1: VMEM resident
            pl.BlockSpec((1, HP), lambda i: (0, 0)),          # b1
            pl.BlockSpec((HP, n_classes), lambda i: (0, 0)),  # w2 (native out width)
            pl.BlockSpec((1, n_classes), lambda i: (0, 0)),   # b2
        ],
        out_specs=pl.BlockSpec((TB, n_classes), lambda i: (i, 0)),  # native-width out
        compiler_params=pltpu.CompilerParams(
            dimension_semantics=("parallel",),  # batch axis sharded across v7x TCs
        ),
        cost_estimate=cost,
    )(x, w1p, b1p, w2p, b2p)


def init_params(key, n_features, n_classes, hidden=10):
    # Deterministic synthetic init mirroring nn.Linear's U(-1/sqrt(fan_in), 1/sqrt(fan_in))
    k1, k2, k3, k4 = jax.random.split(key, 4)
    bound1 = 1.0 / jnp.sqrt(jnp.float32(n_features))
    bound2 = 1.0 / jnp.sqrt(jnp.float32(hidden))
    w1 = jax.random.uniform(k1, (n_features, hidden), jnp.float32, -bound1, bound1)
    b1 = jax.random.uniform(k2, (1, hidden), jnp.float32, -bound1, bound1)
    w2 = jax.random.uniform(k3, (hidden, n_classes), jnp.float32, -bound2, bound2)
    b2 = jax.random.uniform(k4, (1, n_classes), jnp.float32, -bound2, bound2)
    return w1, b1, w2, b2


def _ref_forward(x, w1, b1, w2, b2):
    return jnp.maximum(x @ w1 + b1, 0.0) @ w2 + b2


if __name__ == "__main__":
    key = jax.random.PRNGKey(0)
    n_features, n_classes, batch = 5, 3, 8

    kx, kp = jax.random.split(key)
    x = jax.random.normal(kx, (batch, n_features), jnp.float32)
    w1, b1, w2, b2 = init_params(kp, n_features, n_classes)

    # One-time param prep (hoisted out of the per-call path).
    w1p, b1p, w2p, b2p = prepare_params(w1, b1, w2, b2)
    w1p, b1p, w2p, b2p = jax.block_until_ready((w1p, b1p, w2p, b2p))

    # Small single-tile path (B=8).
    out = net_forward(x, w1p, b1p, w2p, b2p)
    jax.block_until_ready(out)
    ref = _ref_forward(x, w1, b1, w2, b2)
    assert out.shape == (batch, n_classes)
    assert jnp.allclose(out, ref, atol=1e-5), "mismatch vs reference (small)"

    # Ragged batch: exercises the partial last tile (boundary-masked read/write).
    xr = jax.random.normal(kx, (1000, n_features), jnp.float32)
    outr = net_forward(xr, w1p, b1p, w2p, b2p, tb=512)
    jax.block_until_ready(outr)
    refr = _ref_forward(xr, w1, b1, w2, b2)
    assert outr.shape == (1000, n_classes)
    assert jnp.allclose(outr, refr, atol=1e-5), "mismatch vs reference (ragged)"

    # Larger batch with the default TB=2048 multi-tile path.
    xb = jax.random.normal(kx, (4096, n_features), jnp.float32)
    outb = net_forward(xb, w1p, b1p, w2p, b2p)
    jax.block_until_ready(outb)
    refb = _ref_forward(xb, w1, b1, w2, b2)
    assert outb.shape == (4096, n_classes)
    assert jnp.allclose(outb, refb, atol=1e-5), "mismatch vs reference (tiled)"

    # Optional bf16 output (halves the remaining writeback); looser tolerance.
    out_bf16 = net_forward(x, w1p, b1p, w2p, b2p, out_dtype=jnp.bfloat16)
    jax.block_until_ready(out_bf16)
    assert jnp.allclose(out_bf16.astype(jnp.float32), ref, atol=5e-2, rtol=5e-2), \
        "mismatch vs reference (bf16 out)"

    print("KERNEL_OK")
</pallas_src>

<mosaic_0001>
module attributes {stable_mosaic.version = 11 : i64} {
  func.func @mlp_kernel(%arg0: i32, %arg1: memref<8x5xf32, #tpu.memory_space<vmem>>, %arg2: memref<5x128xf32, #tpu.memory_space<vmem>>, %arg3: memref<1x128xf32, #tpu.memory_space<vmem>>, %arg4: memref<128x3xf32, #tpu.memory_space<vmem>>, %arg5: memref<1x3xf32, #tpu.memory_space<vmem>>, %arg6: memref<8x3xf32, #tpu.memory_space<vmem>>) attributes {dimension_semantics = [#tpu.dimension_semantics<parallel>], iteration_bounds = array<i64: 1>, scalar_prefetch = 0 : i64, scratch_operands = 0 : i64, tpu.core_type = #tpu.core_type<tc>, window_params = [{transform_indices = @transform_0, window_bounds = array<i64: 8, 5>}, {pipeline_mode = #tpu.pipeline_mode<synchronous>, transform_indices = @transform_1, window_bounds = array<i64: 5, 128>}, {pipeline_mode = #tpu.pipeline_mode<synchronous>, transform_indices = @transform_2, window_bounds = array<i64: 1, 128>}, {pipeline_mode = #tpu.pipeline_mode<synchronous>, transform_indices = @transform_3, window_bounds = array<i64: 128, 3>}, {pipeline_mode = #tpu.pipeline_mode<synchronous>, transform_indices = @transform_4, window_bounds = array<i64: 1, 3>}, {transform_indices = @transform_5, window_bounds = array<i64: 8, 3>}]} {
    %c0 = arith.constant 0 : index
    %c0_0 = arith.constant 0 : index
    %0 = vector.load %arg1[%c0, %c0_0] : memref<8x5xf32, #tpu.memory_space<vmem>>, vector<8x5xf32>
    %c0_1 = arith.constant 0 : index
    %c0_2 = arith.constant 0 : index
    %1 = vector.load %arg2[%c0_1, %c0_2] : memref<5x128xf32, #tpu.memory_space<vmem>>, vector<5x128xf32>
    %cst = arith.constant dense<0.000000e+00> : vector<8x128xf32>
    %2 = tpu.matmul %0, %1, %cst {dimension_numbers = #tpu.dot_dimension_numbers<[1], [0], [0], [1], [0, 0, 1, 1], [], []>} : vector<8x5xf32>, vector<5x128xf32>, vector<8x128xf32> -> vector<8x128xf32>
    %c0_3 = arith.constant 0 : index
    %c0_4 = arith.constant 0 : index
    %3 = vector.load %arg3[%c0_3, %c0_4] : memref<1x128xf32, #tpu.memory_space<vmem>>, vector<1x128xf32>
    %4 = vector.broadcast %3 : vector<1x128xf32> to vector<8x128xf32>
    %5 = arith.addf %2, %4 : vector<8x128xf32>
    %cst_5 = arith.constant 0.000000e+00 : f32
    %6 = vector.broadcast %cst_5 : f32 to vector<8x128xf32>
    %7 = arith.maximumf %5, %6 : vector<8x128xf32>
    %c0_6 = arith.constant 0 : index
    %c0_7 = arith.constant 0 : index
    %8 = vector.load %arg4[%c0_6, %c0_7] : memref<128x3xf32, #tpu.memory_space<vmem>>, vector<128x3xf32>
    %cst_8 = arith.constant dense<0.000000e+00> : vector<8x3xf32>
    %9 = tpu.matmul %7, %8, %cst_8 {dimension_numbers = #tpu.dot_dimension_numbers<[1], [0], [0], [1], [0, 0, 1, 1], [], []>} : vector<8x128xf32>, vector<128x3xf32>, vector<8x3xf32> -> vector<8x3xf32>
    %c0_9 = arith.constant 0 : index
    %c0_10 = arith.constant 0 : index
    %10 = vector.load %arg5[%c0_9, %c0_10] : memref<1x3xf32, #tpu.memory_space<vmem>>, vector<1x3xf32>
    %11 = vector.broadcast %10 : vector<1x3xf32> to vector<8x3xf32>
    %12 = arith.addf %9, %11 : vector<8x3xf32>
    %c0_11 = arith.constant 0 : index
    %c0_12 = arith.constant 0 : index
    %13 = vector.load %arg6[%c0_11, %c0_12] : memref<8x3xf32, #tpu.memory_space<vmem>>, vector<8x3xf32>
    tpu.vector_store %arg6[%c0_11, %c0_12], %12 {strides = array<i32>} : memref<8x3xf32, #tpu.memory_space<vmem>>, vector<8x3xf32>,
    return
  }
  func.func @transform_0(%arg0: i32) -> (i32, i32) {
    %c0_i32 = arith.constant 0 : i32
    %c0_i32_0 = arith.constant 0 : i32
    return %arg0, %c0_i32 : i32, i32
  }
  func.func @transform_1(%arg0: i32) -> (i32, i32) {
    %c0_i32 = arith.constant 0 : i32
    %c0_i32_0 = arith.constant 0 : i32
    %c0_i32_1 = arith.constant 0 : i32
    return %c0_i32, %c0_i32_0 : i32, i32
  }
  func.func @transform_2(%arg0: i32) -> (i32, i32) {
    %c0_i32 = arith.constant 0 : i32
    %c0_i32_0 = arith.constant 0 : i32
    %c0_i32_1 = arith.constant 0 : i32
    return %c0_i32, %c0_i32_0 : i32, i32
  }
  func.func @transform_3(%arg0: i32) -> (i32, i32) {
    %c0_i32 = arith.constant 0 : i32
    %c0_i32_0 = arith.constant 0 : i32
    %c0_i32_1 = arith.constant 0 : i32
    return %c0_i32, %c0_i32_0 : i32, i32
  }
  func.func @transform_4(%arg0: i32) -> (i32, i32) {
    %c0_i32 = arith.constant 0 : i32
    %c0_i32_0 = arith.constant 0 : i32
    %c0_i32_1 = arith.constant 0 : i32
    return %c0_i32, %c0_i32_0 : i32, i32
  }
  func.func @transform_5(%arg0: i32) -> (i32, i32) {
    %c0_i32 = arith.constant 0 : i32
    %c0_i32_0 = arith.constant 0 : i32
    return %arg0, %c0_i32 : i32, i32
  }
}

</mosaic_0001>

<bundles_post_ra>
// kernel: tpu_custom_call.1
= control target key start
LH: loop header
LB: loop body
LE: loop exit
PB: predicated region body
PF: predicated region fallthrough
CT: control target
= control target key end

     0   :  { %vm33_vm0 = vcmask 1044480   ;;  %vm29_vm1 = vcmask 39936   ;;  %v297_v0 = vmov 0.0   ;;  %vm298_vm2 = vmmov 0   ;;  %s393_s1 = inlined_call_operand.vmem [shape: f32[5,128], index: 1, kind: input, shape index: {}]   ;;  %s394_s0 = inlined_call_operand.vmem [shape: f32[8,5], index: 0, kind: input, shape index: {}]   ;;  %s395_s3 = inlined_call_operand.vmem [shape: f32[128,3], index: 3, kind: input, shape index: {}]   ;;  %s396_s2 = inlined_call_operand.vmem [shape: f32[1,128], index: 2, kind: input, shape index: {}]   ;;  %s397_s4 = inlined_call_operand.vmem [shape: f32[1,3], index: 4, kind: input, shape index: {}]   ;;  %s398_s5 = inlined_call_operand.vmem [shape: f32[8,3], index: 5, kind: output, shape index: {}]  }
   0x1   :  { %230 = vmatprep.subr.mxu0 %v297_v0  ;;  %v21_v1 = vld [vmem:[%s393_s1] sm:$0x1f]  ;;  %232 = vmatprep.mubr.msk.f32.mxu0 %vm298_vm2, %v297_v0  ;;  %v299_v4 = vmov 0.0|0.0   ;;  %v109_v5 = vld [vmem:[%s395_s3 + $0x8] sm:$0xff]  ;;  %v110_v6 = vld [vmem:[%s395_s3 + $0x10] sm:$0xff]  ;;  %vm201_vm3 = vcmask 23552  }
   0x2   :  { %v20_v2 = vld [vmem:[%s394_s0] sm:$0xff]  ;;  %231 = vmatpush3.msk.msra.mxu0 %vm33_vm0, %v21_v1  ;;  %270 = vmatprep.subr.bf16.mxu1 %v299_v4  ;;  %v111_v7 = vld [vmem:[%s395_s3 + $0x18] sm:$0xff]  ;;  %v113_v11 = vld [vmem:[%s395_s3 + $0x28] sm:$0xff] }
   0x3   :  { %v108_v3 = vld [vmem:[%s395_s3] sm:$0xff]  ;;  %233 = vmatmul.mubr.msk.f32.vlgmr.msra.gmra.mrb[0].mxu0 %vm29_vm1, %v20_v2  ;;  %267 = vmatprep.mubr.msk.f32.mxu1 %vm298_vm2, %v297_v0  ;;  %v274_v9 = vpack.c.bf16 %v111_v7, %v110_v6  ;;  %v114_v13 = vld [vmem:[%s395_s3 + $0x30] sm:$0xff]  ;;  %v115_v14 = vld [vmem:[%s395_s3 + $0x38] sm:$0xff] }
   0x4   :  { %v271_v8 = vpack.c.bf16 %v109_v5, %v108_v3  ;;  %v112_v10 = vld [vmem:[%s395_s3 + $0x20] sm:$0xff]  ;;  %v280_v15 = vpack.c.bf16 %v115_v14, %v114_v13  ;;  %v117_v17 = vld [vmem:[%s395_s3 + $0x48] sm:$0xff]  ;;  %v118_v19 = vld [vmem:[%s395_s3 + $0x50] sm:$0xff] }
   0x5   :  { %v277_v12 = vpack.c.bf16 %v113_v11, %v112_v10  ;;  %v116_v16 = vld [vmem:[%s395_s3 + $0x40] sm:$0xff]  ;;  %v119_v20 = vld [vmem:[%s395_s3 + $0x58] sm:$0xff]  ;;  %v121_v23 = vld [vmem:[%s395_s3 + $0x68] sm:$0xff] }
   0x6   :  { %272 = vmatpush3.bf16.msra.mxu1 %v271_v8  ;;  %v283_v18 = vpack.c.bf16 %v117_v17, %v116_v16  ;;  %v286_v21 = vpack.c.bf16 %v119_v20, %v118_v19  ;;  %v120_v22 = vld [vmem:[%s395_s3 + $0x60] sm:$0xff]  ;;  %v122_v25 = vld [vmem:[%s395_s3 + $0x70] sm:$0xff]  ;;  %v123_v26 = vld [vmem:[%s395_s3 + $0x78] sm:$0xff] }
   0x7   :  { %273 = vmatprep.subr.bf16.mxu1 %v299_v4  ;;  %v289_v24 = vpack.c.bf16 %v121_v23, %v120_v22  ;;  %v292_v27 = vpack.c.bf16 %v123_v26, %v122_v25  ;;  %v207_v28 = vld [vmem:[%s396_s2] ss:$0 sm:$0xff] }
   0x8   :  { %v210_v33 = vld [vmem:[%s397_s4] ss:$0 sm:$0xff] }
   0xa   :  { %275 = vmatpush3.bf16.msra.mxu1 %v274_v9 }
   0xb   :  { %276 = vmatprep.subr.bf16.mxu1 %v299_v4 }
   0xe   :  { %278 = vmatpush3.bf16.msra.mxu1 %v277_v12 }
   0xf   :  { %279 = vmatprep.subr.bf16.mxu1 %v299_v4 }
  0x12   :  { %281 = vmatpush3.bf16.msra.mxu1 %v280_v15 }
  0x13   :  { %282 = vmatprep.subr.bf16.mxu1 %v299_v4 }
  0x16   :  { %284 = vmatpush3.bf16.msra.mxu1 %v283_v18 }
  0x17   :  { %285 = vmatprep.subr.bf16.mxu1 %v299_v4 }
  0x1a   :  { %287 = vmatpush3.bf16.msra.mxu1 %v286_v21 }
  0x1b   :  { %288 = vmatprep.subr.bf16.mxu1 %v299_v4 }
  0x1e   :  { %290 = vmatpush3.bf16.msra.mxu1 %v289_v24 }
  0x1f   :  { %291 = vmatprep.subr.bf16.mxu1 %v299_v4 }
  0x22   :  { %293 = vmatpush3.bf16.msra.mxu1 %v292_v27 }
  0xd6   :  { %v103_v29 = vpop.f32.mrb[0].mxu0 }
  0xd7   :  { %v104_v30 = vadd.f32 %v207_v28, %v103_v29  ;;  %v234_v31 = vpop.f32.mrb[1].mxu0 }
  0xd9   :  { %v107_v32 = vmax.f32 %v104_v30, 0.0 }
  0xdb   :  { %268 = vmatmul.mubr.f32.vlgmr.msra.gmra.mrb[0].mxu1 %v107_v32 }
 0x1ae   :  { %v197_v34 = vpop.f32.mrb[0].mxu1 }
 0x1af   :  { %v198_v35 = vadd.f32 %v210_v33, %v197_v34  ;;  %v269_v36 = vpop.f32.mrb[1].mxu1 }
 0x1b1   :  { %202 = vst.msk [vmem:[%s398_s5] sm:$0xff] %vm201_vm3, %v198_v35 }

</bundles_post_ra>
